<compile_context>
chip_gen: v6e
topology: v6e:2x2x1
jax: 0.10.0
libtpu: 0.0.40
codegen_flags: <defaults>
</compile_context>

<pallas_src>
import functools

import jax
import jax.numpy as jnp
from jax.experimental import pallas as pl
from jax.experimental.pallas import tpu as pltpu

LANE = 128


def _scale_kernel(scale_ref, x_ref, o_ref, *, lr_mult):
    # scale_ref: SMEM (1,) f32 ; x_ref / o_ref: VMEM (block_rows, lane_w)
    s = jnp.abs(scale_ref[0] * lr_mult).astype(x_ref.dtype)  # scalar slot, ~free
    o_ref[...] = x_ref[...] * s                              # VPU broadcast multiply


def _tuning_for_device():
    """Per-generation (target_block_bytes, vmem_limit_bytes-or-None)."""
    kind = ""
    try:
        kind = jax.devices()[0].device_kind.lower()
    except Exception:  # pragma: no cover - defensive
        pass
    if "v5 lite" in kind or "v5e" in kind or "v5lite" in kind:
        # v5e: 16 MiB scoped-VMEM default; 2*(2+2) MiB working set fits.
        return 2 * 1024 * 1024, None
    if "v6" in kind:
        # v6e: 24 MiB working set, 128 MiB physical VMEM -> ample headroom.
        return 6 * 1024 * 1024, 64 * 1024 * 1024
    if "v7" in kind or "7x" in kind or "tpu7" in kind:
        # v7x: 32 MiB working set; raise scoped limit past the 32 MiB default
        # but stay well under the 64 MiB physical VMEM per TensorCore.
        return 8 * 1024 * 1024, 48 * 1024 * 1024
    # Unknown / older generations: conservative.
    return 2 * 1024 * 1024, None


def _pick_lane_width(n_elem):
    """Widest lane-dense last dim (multiple of 128) dividing n_elem, else None."""
    for w in (4096, 2048, 1024, 512, 256, 128):
        if n_elem % w == 0:
            return w
    return None


def _pick_block_rows(rows, lane_w, dtype_bytes, target_block_bytes):
    """Block rows: sublane-aligned, ~target_block_bytes, and >= 2 grid steps
    for medium tensors so megacore ('parallel') sharding has work to split."""
    row_bytes = lane_w * dtype_bytes
    target = max(8, (target_block_bytes // row_bytes) // 8 * 8)
    if rows <= target:
        if rows >= 16:
            # Split into (at least) two blocks for v7x's two TensorCores.
            half = ((rows + 1) // 2 + 7) // 8 * 8
            return min(half, rows)
        return rows  # tiny: single full-extent block (always legal)
    return target


def _run_slab_kernel(slab, scale_param, lr_mult, block_rows, lane_w,
                     vmem_limit, donate_input):
    rows = slab.shape[0]
    grid = (pl.cdiv(rows, block_rows),)

    cp_kwargs = dict(dimension_semantics=("parallel",))  # megacore on v7x
    if vmem_limit is not None:
        cp_kwargs["vmem_limit_bytes"] = int(vmem_limit)

    call_kwargs = {}
    if donate_input:
        # Output reuses the slab's HBM buffer; only valid when the caller
        # donates x (otherwise XLA inserts a protective copy).
        call_kwargs["input_output_aliases"] = {1: 0}

    return pl.pallas_call(
        functools.partial(_scale_kernel, lr_mult=float(lr_mult)),
        out_shape=jax.ShapeDtypeStruct((rows, lane_w), slab.dtype),
        grid=grid,
        in_specs=[
            pl.BlockSpec(memory_space=pltpu.SMEM),                 # (1,) scale
            pl.BlockSpec((block_rows, lane_w), lambda i: (i, 0)),  # streamed tiles
        ],
        out_specs=pl.BlockSpec((block_rows, lane_w), lambda i: (i, 0)),
        compiler_params=pltpu.CompilerParams(**cp_kwargs),
        **call_kwargs,
    )(scale_param, slab)


def scale_layer_forward(x, scale_param, lr_mult=1.0, *,
                        small_tensor_fallback=True,
                        fallback_threshold_bytes=2 * 1024 * 1024,
                        donate_input=False):
    """x: any-shape array (e.g. NCHW); scale_param: (1,) float32."""
    orig_shape = x.shape
    dtype = x.dtype
    n_elem = x.size
    scale_param = scale_param.astype(jnp.float32).reshape((1,))

    if n_elem == 0:
        return x

    itemsize = jnp.dtype(dtype).itemsize
    nbytes = n_elem * itemsize

    # Typical ScaleLayer activations are small: let XLA fuse the scalar
    # multiply into neighbouring ops instead of paying pallas_call overhead.
    if small_tensor_fallback and nbytes < fallback_threshold_bytes:
        return x * jnp.abs(scale_param[0] * lr_mult).astype(dtype)

    target_block_bytes, vmem_limit = _tuning_for_device()
    flat = x.reshape(-1)  # contiguous reshape: no data movement

    lane_w = _pick_lane_width(n_elem)
    if lane_w is not None:
        # Exact lane-dense slab: no padding, no extra HBM passes.
        rows = n_elem // lane_w
        slab = flat.reshape(rows, lane_w)
        block_rows = _pick_block_rows(rows, lane_w, itemsize, target_block_bytes)
        out_slab = _run_slab_kernel(slab, scale_param, lr_mult, block_rows,
                                    lane_w, vmem_limit, donate_input)
        return out_slab.reshape(orig_shape)

    # Ragged: n_elem not a multiple of 128.  Run the kernel on the
    # lane-aligned bulk prefix and finish the < lane_w tail with a plain XLA
    # multiply.  Avoids the full-array pad + slice round trips (each a full
    # HBM read+write) of a padded-slab formulation; only the concatenate of
    # the tiny tail adds traffic.  For the usual ScaleLayer activation sizes
    # (multiples of 128) this path never triggers.
    s = jnp.abs(scale_param[0] * lr_mult).astype(dtype)
    lane_w = next((w for w in (1024, 512, 256, 128) if n_elem >= w), None)
    if lane_w is None:
        return (flat * s).reshape(orig_shape)
    n_bulk = (n_elem // lane_w) * lane_w
    rows = n_bulk // lane_w
    slab = flat[:n_bulk].reshape(rows, lane_w)
    block_rows = _pick_block_rows(rows, lane_w, itemsize, target_block_bytes)
    bulk_out = _run_slab_kernel(slab, scale_param, lr_mult, block_rows,
                                lane_w, vmem_limit, donate_input=False).reshape(-1)
    tail_out = flat[n_bulk:] * s
    return jnp.concatenate([bulk_out, tail_out]).reshape(orig_shape)


def init_scale_param(init_value=1.0, lr_mult=1.0):
    # Matches nn.Parameter(torch.full((1,), init_value / lr_mult))
    return jnp.full((1,), init_value / lr_mult, dtype=jnp.float32)


def _reference(x, scale_param, lr_mult):
    return x * jnp.abs(scale_param * lr_mult).astype(x.dtype)


if __name__ == "__main__":
    key = jax.random.PRNGKey(0)
    init_value, lr_mult = 2.0, 0.5
    scale_param = init_scale_param(init_value, lr_mult)   # abs(scale*lr_mult) == 2.0

    k0, k1, k2 = jax.random.split(key, 3)

    # Primary test case: the module's expected small NCHW activation.
    # Force the Pallas kernel path (default would take the fused-XLA fallback).
    x = jax.random.normal(k0, (2, 4, 16, 16), dtype=jnp.float32)
    out = jax.block_until_ready(
        scale_layer_forward(x, scale_param, lr_mult=lr_mult,
                            small_tensor_fallback=False))
    assert out.shape == x.shape and out.dtype == x.dtype
    assert jnp.allclose(out, _reference(x, scale_param, lr_mult), atol=1e-6), \
        "mismatch (small NCHW, kernel path)"

    # Default path for the same small activation (XLA-fusable fallback).
    out_fb = jax.block_until_ready(
        scale_layer_forward(x, scale_param, lr_mult=lr_mult))
    assert jnp.allclose(out_fb, _reference(x, scale_param, lr_mult), atol=1e-6), \
        "mismatch (small NCHW, fallback path)"

    # Tiled path: big enough (8 MiB f32) to take the kernel path by default
    # and produce a multi-step grid (>= 2 steps for megacore sharding).
    x_big = jax.random.normal(k1, (8, 32, 64, 128), dtype=jnp.float32)
    out_big = jax.block_until_ready(
        scale_layer_forward(x_big, scale_param, lr_mult=lr_mult))
    assert jnp.allclose(out_big, _reference(x_big, scale_param, lr_mult), atol=1e-6), \
        "mismatch (tiled)"

    # Ragged path: element count not divisible by 128 (bulk kernel + XLA tail).
    x_rag = jax.random.normal(k2, (2, 3, 5, 7), dtype=jnp.float32)
    out_rag = jax.block_until_ready(
        scale_layer_forward(x_rag, scale_param, lr_mult=lr_mult,
                            small_tensor_fallback=False))
    assert jnp.allclose(out_rag, _reference(x_rag, scale_param, lr_mult), atol=1e-6), \
        "mismatch (ragged)"

    print("KERNEL_OK")
</pallas_src>

<mosaic_0001>
module attributes {stable_mosaic.version = 11 : i64} {
  func.func @_scale_kernel(%arg0: i32, %arg1: memref<1xf32, #tpu.memory_space<smem>>, %arg2: memref<1x2048xf32, #tpu.memory_space<vmem>>, %arg3: memref<1x2048xf32, #tpu.memory_space<vmem>>) attributes {dimension_semantics = [#tpu.dimension_semantics<parallel>], iteration_bounds = array<i64: 1>, scalar_prefetch = 0 : i64, scratch_operands = 0 : i64, tpu.core_type = #tpu.core_type<tc>, window_params = [{transform_indices = @transform_0, window_bounds = array<i64: 1>}, {transform_indices = @transform_1, window_bounds = array<i64: 1, 2048>}, {transform_indices = @transform_2, window_bounds = array<i64: 1, 2048>}]} {
    %c0 = arith.constant 0 : index
    %0 = memref.load %arg1[%c0] : memref<1xf32, #tpu.memory_space<smem>>
    %cst = arith.constant 5.000000e-01 : f32
    %1 = arith.mulf %0, %cst : f32
    %2 = math.absf %1 : f32
    %c0_0 = arith.constant 0 : index
    %c0_1 = arith.constant 0 : index
    %3 = vector.load %arg2[%c0_0, %c0_1] : memref<1x2048xf32, #tpu.memory_space<vmem>>, vector<1x2048xf32>
    %4 = vector.broadcast %2 : f32 to vector<1x2048xf32>
    %5 = arith.mulf %3, %4 : vector<1x2048xf32>
    %c0_2 = arith.constant 0 : index
    %c0_3 = arith.constant 0 : index
    %6 = vector.load %arg3[%c0_2, %c0_3] : memref<1x2048xf32, #tpu.memory_space<vmem>>, vector<1x2048xf32>
    tpu.vector_store %arg3[%c0_2, %c0_3], %5 {strides = array<i32>} : memref<1x2048xf32, #tpu.memory_space<vmem>>, vector<1x2048xf32>,
    return
  }
  func.func @transform_0(%arg0: i32) -> i32 {
    %c0_i32 = arith.constant 0 : i32
    %c0_i32_0 = arith.constant 0 : i32
    return %c0_i32 : i32
  }
  func.func @transform_1(%arg0: i32) -> (i32, i32) {
    %c0_i32 = arith.constant 0 : i32
    %c0_i32_0 = arith.constant 0 : i32
    return %arg0, %c0_i32 : i32, i32
  }
  func.func @transform_2(%arg0: i32) -> (i32, i32) {
    %c0_i32 = arith.constant 0 : i32
    %c0_i32_0 = arith.constant 0 : i32
    return %arg0, %c0_i32 : i32, i32
  }
}

</mosaic_0001>

<bundles_post_ra>
// kernel: tpu_custom_call.1
= control target key start
LH: loop header
LB: loop body
LE: loop exit
PB: predicated region body
PF: predicated region fallthrough
CT: control target
= control target key end

     0   :  { %8 = vsyncpa [#allocation4], 0  ;;  %s122_s0 = inlined_call_operand.<no memory space> [shape: f32[1], index: 0, kind: input, shape index: {}]   ;;  %s123_s1 = inlined_call_operand.hbm [shape: f32[1,2048], index: 1, kind: input, shape index: {}]   ;;  %s124_s2 = inlined_call_operand.hbm [shape: f32[1,2048], index: 2, kind: output, shape index: {}]  }
   0x1   :  { %9 = vsyncpa [#allocation5], 0  ;;  %s96_s9 = smov [#allocation3]  }
   0x2   :  { %s18_s10 = sshll.u32 %s96_s9, 4  ;;  %s19_s10 = int_to_ptr.vmem [resolvable:$true] %s18_s10 }
   0x3   :  { %s60_s11 = scalar_lea.vmem %s19_s10, 256  ;;  %p65_p1 = scmp.lt.s32.totalorder %s19_s10, %s19_s10 }
   0x4   :  { %p61_p0 = scmp.ne.s32.totalorder %s19_s10, %s60_s11  ;;  %p66_p2 = scmp.lt.s32.totalorder %s60_s11, %s60_s11 }
   0x6   :  { %p67_p3 = por %p66_p2, %p65_p1 }
   0x8   :  { %p68_p4 = pnand %p67_p3, %p61_p0 }
   0xa   :  { %71 = shalt.err (!%p68_p4)
}
   0xb   :  { %21 = dma.hbm_to_vmem [thread:$0]  %s123_s1, 256, %s19_s10, [#allocation4]  }
   0xc   :  { %92 = dma.done.wait [#allocation4], 256  }
   0xd   :  { %93 = vsyncadd [#allocation4], 4294967040  ;;  %s26_s16 = smul.f32 0.5, %s122_s0  ;;  %s97_s18 = smov [#allocation6]   ;;  %v28_v1 = vld [vmem:[#allocation3] sm:$0xff]  ;;  %v29_v2 = vld [vmem:[#allocation3 + $0x8] sm:$0xff] }
   0xe   :  { %s41_s19 = sshll.u32 %s97_s18, 4  ;;  %s42_s19 = int_to_ptr.vmem [resolvable:$true] %s41_s19 }
   0xf   :  { %s27_s17 = sand.u32 2147483647, %s26_s16  ;;  %s72_s20 = scalar_lea.vmem %s42_s19, 256 }
  0x10   :  { %v30_v0 = vstv %s27_s17  ;;  %p73_p5 = scmp.ne.s32.totalorder %s42_s19, %s72_s20  ;;  %p77_p6 = scmp.lt.s32.totalorder %s42_s19, %s42_s19 }
  0x11   :  { %v31_v3 = vmul.f32 %v30_v0, %v28_v1  ;;  %v32_v4 = vmul.f32 %v30_v0, %v29_v2  ;;  %p78_p7 = scmp.lt.s32.totalorder %s72_s20, %s72_s20 }
  0x13   :  { %33 = vst [vmem:[#allocation6] sm:$0xff] %v31_v3  ;;  %34 = vst [vmem:[#allocation6 + $0x8] sm:$0xff] %v32_v4  ;;  %p79_p8 = por %p78_p7, %p77_p6 }
  0x15   :  { %p80_p9 = pnand %p79_p8, %p73_p5 }
  0x17   :  { %83 = shalt.err (!%p80_p9)
}
  0x18   :  { %44 = dma.vmem_to_hbm [thread:$0]  %s42_s19, 256, %s124_s2, [#allocation5]  }
  0x19   :  { %94 = dma.done.wait [#allocation5], 256  }
  0x1a   :  { %95 = vsyncadd [#allocation5], 4294967040 }
  0x1b   :  { %48 = vsyncpa [#allocation4], 1 }
  0x1c   :  { %49 = vsyncpa [#allocation5], 1 }

</bundles_post_ra>
